<compile_context>
chip_gen: v7x
topology: tpu7x:2x2x1
jax: 0.10.0
libtpu: 0.0.40
codegen_flags: <defaults>
</compile_context>

<pallas_src>
import jax
import jax.numpy as jnp
from jax.experimental import pallas as pl
from jax.experimental.pallas import tpu as pltpu

LANE = 128
SUBLANE = 8
MAX_ROWS_PER_TILE = 256    # 256 * 128 = 32768 nodes per grid step (DMA tile)
ROWS_PER_CHUNK = 32        # in-kernel sub-chunk (bounds vreg live ranges)


def _cdiv(a, b):
    return (a + b - 1) // b


def _round_up(a, b):
    return _cdiv(a, b) * b


def _make_node_class_loss_kernel(num_chunks, chunk_rows):
    """Kernel factory; num_chunks/chunk_rows are trace-time constants."""

    def kernel(logits_ref, labels_ref, loss_ref, corr_ref, cnt_ref):
        # Grid-resident (8,128) accumulators: same output block every step along the
        # single "arbitrary" axis; init on the first step.
        @pl.when(pl.program_id(0) == 0)
        def _():
            loss_ref[...] = jnp.zeros_like(loss_ref)
            corr_ref[...] = jnp.zeros_like(corr_ref)
            cnt_ref[...] = jnp.zeros_like(cnt_ref)

        num_classes = logits_ref.shape[0]

        def rowsum(x):
            # (chunk_rows, 128) -> (8, 128): aligned sublane-chunk adds, pure VPU.
            return jnp.sum(x.reshape(chunk_rows // SUBLANE, SUBLANE, LANE), axis=0)

        def chunk_body(ci, carry):
            loss_acc, corr_acc, cnt_acc = carry
            r0 = pl.multiple_of(ci * chunk_rows, chunk_rows)

            labels = labels_ref[pl.ds(r0, chunk_rows), :]              # (cr, 128) int32
            valid = jnp.logical_and(labels >= 0, labels < num_classes)
            validf = valid.astype(jnp.float32)

            # Pass 1: running max + first-index argmax (per-class VMEM loads, VPU only).
            amax = logits_ref[0, pl.ds(r0, chunk_rows), :].astype(jnp.float32)
            aidx = jnp.zeros_like(labels)
            for cls in range(1, num_classes):
                rk = logits_ref[cls, pl.ds(r0, chunk_rows), :].astype(jnp.float32)
                better = rk > amax                                     # strict > -> first max
                amax = jnp.where(better, rk, amax)
                aidx = jnp.where(better, cls, aidx)

            # Pass 2: sum-exp + true-class logit gather (re-read per class; vld has slack).
            sumexp = jnp.zeros_like(amax)
            true_logit = jnp.zeros_like(amax)
            for cls in range(num_classes):
                rk = logits_ref[cls, pl.ds(r0, chunk_rows), :].astype(jnp.float32)
                sumexp = sumexp + jnp.exp(rk - amax)
                true_logit = true_logit + jnp.where(labels == cls, rk, 0.0)

            # cross-entropy with logits: lse(logits) - logit[label]
            ce = amax + jnp.log(sumexp) - true_logit
            correct = (aidx == labels).astype(jnp.float32)

            return (loss_acc + rowsum(ce * validf),
                    corr_acc + rowsum(correct * validf),
                    cnt_acc + rowsum(validf))

        zeros = jnp.zeros((SUBLANE, LANE), jnp.float32)
        loss_acc, corr_acc, cnt_acc = jax.lax.fori_loop(
            0, num_chunks, chunk_body, (zeros, zeros, zeros))

        loss_ref[...] += loss_acc
        corr_ref[...] += corr_acc
        cnt_ref[...] += cnt_acc

    return kernel


def node_class_loss(node_pred, node_assn, *, max_rows_per_tile=MAX_ROWS_PER_TILE):
    """Masked cross-entropy (mean over valid nodes), accuracy and valid count via Pallas."""
    c, k = node_pred.shape

    rows_needed = max(_cdiv(c, LANE), 1)
    if rows_needed <= ROWS_PER_CHUNK:
        rows_tile = _round_up(rows_needed, SUBLANE)
        chunk_rows = rows_tile
    else:
        rows_tile = min(max_rows_per_tile, _round_up(rows_needed, ROWS_PER_CHUNK))
        chunk_rows = ROWS_PER_CHUNK
    num_chunks = rows_tile // chunk_rows
    num_tiles = max(_cdiv(rows_needed, rows_tile), 1)
    n_rows = num_tiles * rows_tile
    c_pad = n_rows * LANE
    pad = c_pad - c

    # Keep the original logits dtype (kernel casts per chunk). Padded nodes get 0-logits
    # and label -1, so they contribute exactly nothing to the sums.
    # TODO(synk): a producer emitting (K, C) logits directly would remove this extra HBM pass.
    logits = jnp.pad(node_pred.T, ((0, 0), (0, pad))).reshape(k, n_rows, LANE)
    labels = jnp.pad(node_assn.astype(jnp.int32), (0, pad),
                     constant_values=-1).reshape(n_rows, LANE)

    part_shape = jax.ShapeDtypeStruct((SUBLANE, LANE), jnp.float32)
    out_block = pl.BlockSpec((SUBLANE, LANE), lambda i: (0, 0))

    kernel = _make_node_class_loss_kernel(num_chunks, chunk_rows)
    loss_part, corr_part, cnt_part = pl.pallas_call(
        kernel,
        out_shape=(part_shape, part_shape, part_shape),
        grid_spec=pltpu.PrefetchScalarGridSpec(
            num_scalar_prefetch=0,
            grid=(num_tiles,),
            in_specs=[
                pl.BlockSpec((k, rows_tile, LANE), lambda i: (0, i, 0)),
                pl.BlockSpec((rows_tile, LANE), lambda i: (i, 0)),
            ],
            out_specs=[out_block, out_block, out_block]),
        compiler_params=pltpu.CompilerParams(
            dimension_semantics=("arbitrary",)),
    )(logits, labels)

    # Tiny final reduction (3 x (8,128)) done in XLA.
    loss_sum = jnp.sum(loss_part)
    corr_sum = jnp.sum(corr_part)
    count = jnp.sum(cnt_part)

    loss = jnp.where(count > 0, loss_sum / jnp.maximum(count, 1.0), loss_sum)
    acc = jnp.where(count > 0, corr_sum / jnp.maximum(count, 1.0), 1.0)
    # TODO(synk): balance_loss / per-class weights of the PyTorch module are not implemented
    # (defaults balance_loss=False, weights=None are reproduced exactly).
    return {'accuracy': acc, 'loss': loss, 'count': count.astype(jnp.int32)}


def get_cluster_label(clust_label, clusts, column, num_label_values):
    """Plain-JAX glue: per-cluster majority vote of voxel labels (get_cluster_label_batch)."""
    vox_labels = clust_label[:, column].astype(jnp.int32)          # (N,)
    safe_idx = jnp.maximum(clusts, 0)
    gathered = vox_labels[safe_idx]                                # (C, V)
    vote_ok = jnp.logical_and(clusts >= 0, gathered >= 0)          # (C, V)
    onehot = jnp.logical_and(gathered[..., None] == jnp.arange(num_label_values),
                             vote_ok[..., None])
    counts = jnp.sum(onehot.astype(jnp.int32), axis=1)             # (C, L)
    has_vote = jnp.sum(counts, axis=1) > 0
    maj = jnp.argmax(counts, axis=1).astype(jnp.int32)
    return jnp.where(has_vote, maj, -1)


if __name__ == "__main__":
    key = jax.random.PRNGKey(0)
    k_lbl, k_clust, k_pred = jax.random.split(key, 3)

    # Synthetic batch: N voxels, D=3 coords, 2 feature cols, target column = last.
    N, D, NF = 256, 3, 2
    C, V = 20, 16                    # C clusters, up to V voxels each (-1 padded)
    NUM_CLASSES = 2                  # node_pred is (C, 2) binary logits
    TARGET_COL = 1 + D + NF - 1      # last column of clust_label

    clust_label = jnp.zeros((N, 1 + D + NF), jnp.float32)
    # voxel labels in {-1, 0, 1, 2} (includes invalid and out-of-range classes)
    vox_lbl = jax.random.randint(k_lbl, (N,), -1, 3).astype(jnp.float32)
    clust_label = clust_label.at[:, TARGET_COL].set(vox_lbl)

    # clusters: each cluster is a random set of voxel IDs, some slots padded with -1
    clusts = jax.random.randint(k_clust, (C, V), 0, N)
    pad_mask = jax.random.bernoulli(k_clust, 0.25, (C, V))
    clusts = jnp.where(pad_mask, -1, clusts).astype(jnp.int32)

    node_pred = jax.random.normal(k_pred, (C, NUM_CLASSES), jnp.float32)

    # Label extraction (glue) + Pallas loss kernel
    node_assn = get_cluster_label(clust_label, clusts, TARGET_COL, num_label_values=4)
    out = node_class_loss(node_pred, node_assn)
    out = jax.tree_util.tree_map(jax.block_until_ready, out)

    # Pure-JAX reference check
    valid = jnp.logical_and(node_assn >= 0, node_assn < NUM_CLASSES)
    safe = jnp.clip(node_assn, 0, NUM_CLASSES - 1)
    logp = jax.nn.log_softmax(node_pred, axis=-1)
    ce = -logp[jnp.arange(C), safe]
    cnt_ref = jnp.sum(valid)
    loss_ref = jnp.where(cnt_ref > 0,
                         jnp.sum(jnp.where(valid, ce, 0.0)) / jnp.maximum(cnt_ref, 1),
                         0.0)
    acc_ref = jnp.where(cnt_ref > 0,
                        jnp.sum(jnp.where(valid,
                                          (jnp.argmax(node_pred, axis=1) == safe), False))
                        / jnp.maximum(cnt_ref, 1),
                        1.0)

    assert jnp.allclose(out['loss'], loss_ref, rtol=1e-5, atol=1e-5), (out['loss'], loss_ref)
    assert jnp.allclose(out['accuracy'], acc_ref, rtol=1e-5, atol=1e-5), (out['accuracy'], acc_ref)
    assert int(out['count']) == int(cnt_ref), (out['count'], cnt_ref)

    print("KERNEL_OK")
</pallas_src>

<mosaic_0001>
module attributes {stable_mosaic.version = 11 : i64} {
  func.func @kernel(%arg0: i32, %arg1: memref<2x8x128xf32, #tpu.memory_space<vmem>>, %arg2: memref<8x128xi32, #tpu.memory_space<vmem>>, %arg3: memref<8x128xf32, #tpu.memory_space<vmem>>, %arg4: memref<8x128xf32, #tpu.memory_space<vmem>>, %arg5: memref<8x128xf32, #tpu.memory_space<vmem>>) attributes {dimension_semantics = [#tpu.dimension_semantics<arbitrary>], iteration_bounds = array<i64: 1>, scalar_prefetch = 0 : i64, scratch_operands = 0 : i64, tpu.core_type = #tpu.core_type<tc>, window_params = [{transform_indices = @transform_0, window_bounds = array<i64: 2, 8, 128>}, {transform_indices = @transform_1, window_bounds = array<i64: 8, 128>}, {pipeline_mode = #tpu.pipeline_mode<synchronous>, transform_indices = @transform_2, window_bounds = array<i64: 8, 128>}, {pipeline_mode = #tpu.pipeline_mode<synchronous>, transform_indices = @transform_3, window_bounds = array<i64: 8, 128>}, {pipeline_mode = #tpu.pipeline_mode<synchronous>, transform_indices = @transform_4, window_bounds = array<i64: 8, 128>}]} {
    %c0_i32 = arith.constant 0 : i32
    %0 = arith.cmpi eq, %arg0, %c0_i32 : i32
    %1 = arith.extui %0 : i1 to i32
    %c0_i32_0 = arith.constant 0 : i32
    %2 = arith.cmpi ne, %1, %c0_i32_0 : i32
    scf.if %2 {
      %cst_33 = arith.constant 0.000000e+00 : f32
      %76 = vector.broadcast %cst_33 : f32 to vector<8x128xf32>
      %c0_34 = arith.constant 0 : index
      %c0_35 = arith.constant 0 : index
      %77 = vector.load %arg3[%c0_34, %c0_35] : memref<8x128xf32, #tpu.memory_space<vmem>>, vector<8x128xf32>
      tpu.vector_store %arg3[%c0_34, %c0_35], %76 {strides = array<i32>} : memref<8x128xf32, #tpu.memory_space<vmem>>, vector<8x128xf32>,
      %cst_36 = arith.constant 0.000000e+00 : f32
      %78 = vector.broadcast %cst_36 : f32 to vector<8x128xf32>
      %c0_37 = arith.constant 0 : index
      %c0_38 = arith.constant 0 : index
      %79 = vector.load %arg4[%c0_37, %c0_38] : memref<8x128xf32, #tpu.memory_space<vmem>>, vector<8x128xf32>
      tpu.vector_store %arg4[%c0_37, %c0_38], %78 {strides = array<i32>} : memref<8x128xf32, #tpu.memory_space<vmem>>, vector<8x128xf32>,
      %cst_39 = arith.constant 0.000000e+00 : f32
      %80 = vector.broadcast %cst_39 : f32 to vector<8x128xf32>
      %c0_40 = arith.constant 0 : index
      %c0_41 = arith.constant 0 : index
      %81 = vector.load %arg5[%c0_40, %c0_41] : memref<8x128xf32, #tpu.memory_space<vmem>>, vector<8x128xf32>
      tpu.vector_store %arg5[%c0_40, %c0_41], %80 {strides = array<i32>} : memref<8x128xf32, #tpu.memory_space<vmem>>, vector<8x128xf32>,
    } else {
    }
    %cst = arith.constant 0.000000e+00 : f32
    %3 = vector.broadcast %cst : f32 to vector<8x128xf32>
    %c0_i32_1 = arith.constant 0 : i32
    %c8_i32 = arith.constant 8 : i32
    %4 = arith.muli %c0_i32_1, %c8_i32 : i32
    %5 = tpu.assume_multiple %4, 8 : i32
    %6 = arith.index_cast %5 : i32 to index
    %c0 = arith.constant 0 : index
    %7 = vector.load %arg2[%6, %c0] : memref<8x128xi32, #tpu.memory_space<vmem>>, vector<8x128xi32>
    %c0_i32_2 = arith.constant 0 : i32
    %8 = vector.broadcast %c0_i32_2 : i32 to vector<8x128xi32>
    %9 = arith.cmpi sge, %7, %8 : vector<8x128xi32>
    %c2_i32 = arith.constant 2 : i32
    %10 = vector.broadcast %c2_i32 : i32 to vector<8x128xi32>
    %11 = arith.cmpi slt, %7, %10 : vector<8x128xi32>
    %12 = arith.andi %9, %11 : vector<8x128xi1>
    %13 = arith.extui %12 : vector<8x128xi1> to vector<8x128xi32>
    %14 = arith.sitofp %13 : vector<8x128xi32> to vector<8x128xf32>
    %c0_3 = arith.constant 0 : index
    %15 = arith.index_cast %5 : i32 to index
    %c0_4 = arith.constant 0 : index
    %16 = vector.load %arg1[%c0_3, %15, %c0_4] : memref<2x8x128xf32, #tpu.memory_space<vmem>>, vector<1x8x128xf32>
    %17 = vector.shape_cast %16 : vector<1x8x128xf32> to vector<8x128xf32>
    %c0_i32_5 = arith.constant 0 : i32
    %18 = vector.broadcast %c0_i32_5 : i32 to vector<8x128xi32>
    %c1 = arith.constant 1 : index
    %19 = arith.index_cast %5 : i32 to index
    %c0_6 = arith.constant 0 : index
    %20 = vector.load %arg1[%c1, %19, %c0_6] : memref<2x8x128xf32, #tpu.memory_space<vmem>>, vector<1x8x128xf32>
    %21 = vector.shape_cast %20 : vector<1x8x128xf32> to vector<8x128xf32>
    %22 = arith.cmpf ogt, %21, %17 : vector<8x128xf32>
    %23 = arith.select %22, %21, %17 : vector<8x128xi1>, vector<8x128xf32>
    %c1_i32 = arith.constant 1 : i32
    %24 = vector.broadcast %c1_i32 : i32 to vector<8x128xi32>
    %25 = arith.select %22, %24, %18 : vector<8x128xi1>, vector<8x128xi32>
    %cst_7 = arith.constant 0.000000e+00 : f32
    %26 = vector.broadcast %cst_7 : f32 to vector<8x128xf32>
    %cst_8 = arith.constant 0.000000e+00 : f32
    %27 = vector.broadcast %cst_8 : f32 to vector<8x128xf32>
    %c0_9 = arith.constant 0 : index
    %28 = arith.index_cast %5 : i32 to index
    %c0_10 = arith.constant 0 : index
    %29 = vector.load %arg1[%c0_9, %28, %c0_10] : memref<2x8x128xf32, #tpu.memory_space<vmem>>, vector<1x8x128xf32>
    %30 = vector.shape_cast %29 : vector<1x8x128xf32> to vector<8x128xf32>
    %31 = arith.subf %30, %23 : vector<8x128xf32>
    %32 = math.exp %31 : vector<8x128xf32>
    %33 = arith.addf %26, %32 : vector<8x128xf32>
    %c0_i32_11 = arith.constant 0 : i32
    %34 = vector.broadcast %c0_i32_11 : i32 to vector<8x128xi32>
    %35 = arith.cmpi eq, %7, %34 : vector<8x128xi32>
    %cst_12 = arith.constant 0.000000e+00 : f32
    %36 = vector.broadcast %cst_12 : f32 to vector<8x128xf32>
    %37 = arith.select %35, %30, %36 : vector<8x128xi1>, vector<8x128xf32>
    %38 = arith.addf %27, %37 : vector<8x128xf32>
    %c1_13 = arith.constant 1 : index
    %39 = arith.index_cast %5 : i32 to index
    %c0_14 = arith.constant 0 : index
    %40 = vector.load %arg1[%c1_13, %39, %c0_14] : memref<2x8x128xf32, #tpu.memory_space<vmem>>, vector<1x8x128xf32>
    %41 = vector.shape_cast %40 : vector<1x8x128xf32> to vector<8x128xf32>
    %42 = arith.subf %41, %23 : vector<8x128xf32>
    %43 = math.exp %42 : vector<8x128xf32>
    %44 = arith.addf %33, %43 : vector<8x128xf32>
    %c1_i32_15 = arith.constant 1 : i32
    %45 = vector.broadcast %c1_i32_15 : i32 to vector<8x128xi32>
    %46 = arith.cmpi eq, %7, %45 : vector<8x128xi32>
    %cst_16 = arith.constant 0.000000e+00 : f32
    %47 = vector.broadcast %cst_16 : f32 to vector<8x128xf32>
    %48 = arith.select %46, %41, %47 : vector<8x128xi1>, vector<8x128xf32>
    %49 = arith.addf %38, %48 : vector<8x128xf32>
    %50 = math.log %44 : vector<8x128xf32>
    %51 = arith.addf %23, %50 : vector<8x128xf32>
    %52 = arith.subf %51, %49 : vector<8x128xf32>
    %53 = arith.cmpi eq, %25, %7 : vector<8x128xi32>
    %54 = arith.extui %53 : vector<8x128xi1> to vector<8x128xi32>
    %55 = arith.sitofp %54 : vector<8x128xi32> to vector<8x128xf32>
    %56 = arith.mulf %52, %14 : vector<8x128xf32>
    %57 = vector.shape_cast %56 : vector<8x128xf32> to vector<1x8x128xf32>
    %cst_17 = arith.constant dense<0.000000e+00> : vector<8x128xf32>
    %58 = vector.multi_reduction <add>, %57, %cst_17 [0] : vector<1x8x128xf32> to vector<8x128xf32>
    %59 = arith.addf %3, %58 : vector<8x128xf32>
    %60 = arith.mulf %55, %14 : vector<8x128xf32>
    %61 = vector.shape_cast %60 : vector<8x128xf32> to vector<1x8x128xf32>
    %cst_18 = arith.constant dense<0.000000e+00> : vector<8x128xf32>
    %62 = vector.multi_reduction <add>, %61, %cst_18 [0] : vector<1x8x128xf32> to vector<8x128xf32>
    %63 = arith.addf %3, %62 : vector<8x128xf32>
    %64 = vector.shape_cast %14 : vector<8x128xf32> to vector<1x8x128xf32>
    %cst_19 = arith.constant dense<0.000000e+00> : vector<8x128xf32>
    %65 = vector.multi_reduction <add>, %64, %cst_19 [0] : vector<1x8x128xf32> to vector<8x128xf32>
    %66 = arith.addf %3, %65 : vector<8x128xf32>
    %c1_i32_20 = arith.constant 1 : i32
    %c0_21 = arith.constant 0 : index
    %c0_22 = arith.constant 0 : index
    %67 = vector.load %arg3[%c0_21, %c0_22] : memref<8x128xf32, #tpu.memory_space<vmem>>, vector<8x128xf32>
    %68 = arith.addf %67, %59 : vector<8x128xf32>
    %c0_23 = arith.constant 0 : index
    %c0_24 = arith.constant 0 : index
    %69 = vector.load %arg3[%c0_23, %c0_24] : memref<8x128xf32, #tpu.memory_space<vmem>>, vector<8x128xf32>
    tpu.vector_store %arg3[%c0_23, %c0_24], %68 {strides = array<i32>} : memref<8x128xf32, #tpu.memory_space<vmem>>, vector<8x128xf32>,
    %c0_25 = arith.constant 0 : index
    %c0_26 = arith.constant 0 : index
    %70 = vector.load %arg4[%c0_25, %c0_26] : memref<8x128xf32, #tpu.memory_space<vmem>>, vector<8x128xf32>
    %71 = arith.addf %70, %63 : vector<8x128xf32>
    %c0_27 = arith.constant 0 : index
    %c0_28 = arith.constant 0 : index
    %72 = vector.load %arg4[%c0_27, %c0_28] : memref<8x128xf32, #tpu.memory_space<vmem>>, vector<8x128xf32>
    tpu.vector_store %arg4[%c0_27, %c0_28], %71 {strides = array<i32>} : memref<8x128xf32, #tpu.memory_space<vmem>>, vector<8x128xf32>,
    %c0_29 = arith.constant 0 : index
    %c0_30 = arith.constant 0 : index
    %73 = vector.load %arg5[%c0_29, %c0_30] : memref<8x128xf32, #tpu.memory_space<vmem>>, vector<8x128xf32>
    %74 = arith.addf %73, %66 : vector<8x128xf32>
    %c0_31 = arith.constant 0 : index
    %c0_32 = arith.constant 0 : index
    %75 = vector.load %arg5[%c0_31, %c0_32] : memref<8x128xf32, #tpu.memory_space<vmem>>, vector<8x128xf32>
    tpu.vector_store %arg5[%c0_31, %c0_32], %74 {strides = array<i32>} : memref<8x128xf32, #tpu.memory_space<vmem>>, vector<8x128xf32>,
    return
  }
  func.func @transform_0(%arg0: i32) -> (i32, i32, i32) {
    %c0_i32 = arith.constant 0 : i32
    %c0_i32_0 = arith.constant 0 : i32
    %c0_i32_1 = arith.constant 0 : i32
    return %c0_i32, %arg0, %c0_i32_0 : i32, i32, i32
  }
  func.func @transform_1(%arg0: i32) -> (i32, i32) {
    %c0_i32 = arith.constant 0 : i32
    %c0_i32_0 = arith.constant 0 : i32
    return %arg0, %c0_i32 : i32, i32
  }
  func.func @transform_2(%arg0: i32) -> (i32, i32) {
    %c0_i32 = arith.constant 0 : i32
    %c0_i32_0 = arith.constant 0 : i32
    %c0_i32_1 = arith.constant 0 : i32
    return %c0_i32, %c0_i32_0 : i32, i32
  }
  func.func @transform_3(%arg0: i32) -> (i32, i32) {
    %c0_i32 = arith.constant 0 : i32
    %c0_i32_0 = arith.constant 0 : i32
    %c0_i32_1 = arith.constant 0 : i32
    return %c0_i32, %c0_i32_0 : i32, i32
  }
  func.func @transform_4(%arg0: i32) -> (i32, i32) {
    %c0_i32 = arith.constant 0 : i32
    %c0_i32_0 = arith.constant 0 : i32
    %c0_i32_1 = arith.constant 0 : i32
    return %c0_i32, %c0_i32_0 : i32, i32
  }
}

</mosaic_0001>

<bundles_post_ra>
// kernel: tpu_custom_call.1
= control target key start
LH: loop header
LB: loop body
LE: loop exit
PB: predicated region body
PF: predicated region fallthrough
CT: control target
= control target key end

     0   :  { %10 = vsyncpa [#allocation3], 0  ;;  %s380_s0 = inlined_call_operand.hbm [shape: f32[2,8,128], index: 0, kind: input, shape index: {}]   ;;  %s381_s1 = inlined_call_operand.hbm [shape: s32[8,128], index: 1, kind: input, shape index: {}]   ;;  %s382_s2 = inlined_call_operand.hbm [shape: f32[8,128], index: 2, kind: output, shape index: {0}]   ;;  %s383_s3 = inlined_call_operand.hbm [shape: f32[8,128], index: 3, kind: output, shape index: {1}]   ;;  %s384_s4 = inlined_call_operand.hbm [shape: f32[8,128], index: 4, kind: output, shape index: {2}]  }
   0x1   :  { %11 = vsyncpa [#allocation6], 0 }
   0x2   :  { %12 = vsyncpa [#allocation4], 0 }
   0x3   :  { %13 = vsyncpa [#allocation9], 0  ;;  %s279_s15 = smov [#allocation2]   ;;  %s161_s19 = scalar_lea.hbm %s380_s0, 256 }
   0x4   :  { %s19_s16 = sshll.u32 %s279_s15, 4  ;;  %p162_p0 = scmp.ne.s32.totalorder %s380_s0, %s161_s19  ;;  %s20_s16 = int_to_ptr.vmem [resolvable:$true] %s19_s16 }
   0x5   :  { %p165_p1 = scmp.lt.u32.totalorder %s161_s19, %s380_s0 }
   0x7   :  { %p167_p2 = pnand %p165_p1, %p162_p0 }
   0x9   :  { %170 = shalt.err (!%p167_p2)
}
   0xa   :  { %s171_s24 = scalar_lea.vmem %s20_s16, 256  ;;  %p176_p4 = scmp.lt.s32.totalorder %s20_s16, %s20_s16 }
   0xb   :  { %p172_p3 = scmp.ne.s32.totalorder %s20_s16, %s171_s24  ;;  %p177_p5 = scmp.lt.s32.totalorder %s171_s24, %s171_s24 }
   0xd   :  { %p178_p6 = por %p177_p5, %p176_p4 }
   0xf   :  { %p179_p7 = pnand %p178_p6, %p172_p3 }
  0x11   :  { %182 = shalt.err (!%p179_p7)
}
  0x12   :  { %s280_s25 = smov 128   ;;  %s281_s26 = smov 8  }
  0x13   :  { %25 = dma.hbm_to_vmem [thread:$0]  %s380_s0, 256, %s20_s16, [#allocation3], %s280_s25, %s280_s25, %s281_s26  }
  0x14   :  { %s282_s29 = smov [#allocation5]   ;;  %s183_s7 = scalar_lea.hbm %s381_s1, 128 }
  0x15   :  { %s32_s30 = sshll.u32 %s282_s29, 4  ;;  %p184_p8 = scmp.ne.s32.totalorder %s381_s1, %s183_s7  ;;  %s33_s30 = int_to_ptr.vmem [resolvable:$true] %s32_s30 }
  0x16   :  { %p187_p9 = scmp.lt.u32.totalorder %s183_s7, %s381_s1 }
  0x18   :  { %p189_p10 = pnand %p187_p9, %p184_p8 }
  0x1a   :  { %192 = shalt.err (!%p189_p10)
}
  0x1b   :  { %s193_s12 = scalar_lea.vmem %s33_s30, 128  ;;  %p198_p12 = scmp.lt.s32.totalorder %s33_s30, %s33_s30 }
  0x1c   :  { %p194_p11 = scmp.ne.s32.totalorder %s33_s30, %s193_s12  ;;  %p199_p13 = scmp.lt.s32.totalorder %s193_s12, %s193_s12 }
  0x1e   :  { %p200_p0 = por %p199_p13, %p198_p12 }
  0x20   :  { %p201_p1 = pnand %p200_p0, %p194_p11 }
  0x22   :  { %204 = shalt.err (!%p201_p1)
}
  0x23   :  { %35 = dma.hbm_to_vmem [thread:$0]  %s381_s1, 128, %s33_s30, [#allocation6]  }
  0x24   :  { %271 = dma.done.wait [#allocation3], 256  }
  0x25   :  { %272 = vsyncadd [#allocation3], 4294967040 }
  0x26   :  { %273 = dma.done.wait [#allocation6], 128  }
  0x27   :  { %274 = vsyncadd [#allocation6], 4294967168  ;;  %v337_v0 = vld [vmem:[#allocation5] sm:$0xff]  ;;  %v55_v1 = vld [vmem:[#allocation2] sm:$0xff]  ;;  %v283_v3 = vmov 0   ;;  %v284_v6 = vmov 0.0  }
  0x28   :  { %v58_v2 = vld [vmem:[#allocation2 + $0x8] sm:$0xff]  ;;  %vm50_vm0 = vcmp.ge.s32.totalorder %v337_v0, 0  ;;  %vm51_vm1 = vcmp.lt.s32.totalorder %v337_v0, 2  ;;  %s285_s1 = smov [#allocation8]   ;;  %s286_s15 = smov [#allocation10]  }
  0x29   :  { %vm59_vm2 = vcmp.gt.f32.partialorder %v58_v2, %v55_v1  ;;  %vm52_vm3 = vmand %vm50_vm0, %vm51_vm1  ;;  %s116_s14 = sshll.u32 %s285_s1, 4  ;;  %s126_s16 = sshll.u32 %s286_s15, 4  ;;  %s117_s14 = int_to_ptr.vmem [resolvable:$true] %s116_s14  ;;  %s127_s16 = int_to_ptr.vmem [resolvable:$true] %s126_s16 }
  0x2a   :  { %v61_v4 = vsel %vm59_vm2, 1, %v283_v3  ;;  %v60_v5 = vsel %vm59_vm2, %v58_v2, %v55_v1  ;;  %v144_v7 = vsel %vm52_vm3, 1.0, %v284_v6  ;;  %s205_s17 = scalar_lea.vmem %s117_s14, 128  ;;  %p210_p3 = scmp.lt.s32.totalorder %s117_s14, %s117_s14 }
  0x2b   :  { %vm80_vm4 = vcmp.eq.s32.totalorder %v61_v4, %v337_v0  ;;  %v62_v8 = vsub.f32 %v55_v1, %v60_v5  ;;  %v69_v9 = vsub.f32 %v58_v2, %v60_v5  ;;  %99 = vst [vmem:[#allocation10] sm:$0xff] %v144_v7  ;;  %p206_p2 = scmp.ne.s32.totalorder %s117_s14, %s205_s17  ;;  %p211_p4 = scmp.lt.s32.totalorder %s205_s17, %s205_s17 }
  0x2c   :  { %v145_v10 = vsel %vm80_vm4, 1.0, %v284_v6 }
  0x2d   :  { %v86_v11 = vmul.f32 %v145_v10, %v144_v7  ;;  %v63_v12 = vmul.f32 1.442695, %v62_v8  ;;  %v70_v13 = vmul.f32 1.442695, %v69_v9  ;;  %p212_p5 = por %p211_p4, %p210_p3 }
  0x2f   :  { %155 = vpow2.f32 %v63_v12  ;;  %96 = vst [vmem:[#allocation8] sm:$0xff] %v86_v11  ;;  %p213_p6 = pnand %p212_p5, %p206_p2 }
  0x30   :  { %157 = vpow2.f32 %v70_v13 }
  0x31   :  { %216 = shalt.err (!%p213_p6)
}
  0x32   :  { %s217_s20 = scalar_lea.hbm %s383_s3, 128 }
  0x33   :  { %p218_p7 = scmp.ne.s32.totalorder %s383_s3, %s217_s20  ;;  %p221_p8 = scmp.lt.u32.totalorder %s217_s20, %s383_s3 }
  0x35   :  { %p223_p9 = pnand %p221_p8, %p218_p7 }
  0x37   :  { %226 = shalt.err (!%p223_p9)
}
  0x38   :  { %119 = dma.vmem_to_hbm [thread:$0]  %s117_s14, 128, %s383_s3, [#allocation9]  }
  0x39   :  { %s227_s27 = scalar_lea.vmem %s127_s16, 128  ;;  %p232_p11 = scmp.lt.s32.totalorder %s127_s16, %s127_s16 }
  0x3a   :  { %p228_p10 = scmp.ne.s32.totalorder %s127_s16, %s227_s27  ;;  %p233_p12 = scmp.lt.s32.totalorder %s227_s27, %s227_s27 }
  0x3c   :  { %p234_p13 = por %p233_p12, %p232_p11 }
  0x3e   :  { %p235_p0 = pnand %p234_p13, %p228_p10 }
  0x40   :  { %238 = shalt.err (!%p235_p0)
}
  0x41   :  { %s239_s30 = scalar_lea.hbm %s384_s4, 128 }
  0x42   :  { %p240_p1 = scmp.ne.s32.totalorder %s384_s4, %s239_s30  ;;  %p243_p2 = scmp.lt.u32.totalorder %s239_s30, %s384_s4 }
  0x44   :  { %p245_p3 = pnand %p243_p2, %p240_p1 }
  0x46   :  { %248 = shalt.err (!%p245_p3)
}
  0x47   :  { %129 = dma.vmem_to_hbm [thread:$0]  %s127_s16, 128, %s384_s4, [#allocation9]   ;;  %v156_v14 = vpop.eup %155  ;;  %vm66_vm5 = vcmp.eq.s32.totalorder %v337_v0, 0  ;;  %vm73_vm6 = vcmp.eq.s32.totalorder %v337_v0, 1 }
  0x48   :  { %v158_v15 = vpop.eup %157  ;;  %v67_v17 = vsel %vm66_vm5, %v55_v1, 0.0  ;;  %v74_v18 = vsel %vm73_vm6, %v58_v2, 0.0  ;;  %s287_s10 = smov [#allocation7]  }
  0x49   :  { %v72_v16 = vadd.f32 %v158_v15, %v156_v14  ;;  %v75_v20 = vadd.f32 %v74_v18, %v67_v17  ;;  %s106_s11 = sshll.u32 %s287_s10, 4  ;;  %s107_s11 = int_to_ptr.vmem [resolvable:$true] %s106_s11 }
  0x4a   :  { %s249_s4 = scalar_lea.vmem %s107_s11, 128  ;;  %p254_p5 = scmp.lt.s32.totalorder %s107_s11, %s107_s11 }
  0x4b   :  { %159 = vlog2.f32 %v72_v16  ;;  %p250_p4 = scmp.ne.s32.totalorder %s107_s11, %s249_s4  ;;  %p255_p6 = scmp.lt.s32.totalorder %s249_s4, %s249_s4 }
  0x4d   :  { %p256_p7 = por %p255_p6, %p254_p5 }
  0x4f   :  { %p257_p8 = pnand %p256_p7, %p250_p4 }
  0x55   :  { %v160_v19 = vpop.eup %159 }
  0x56   :  { %v77_v21 = vmul.f32 0.6931472, %v160_v19 }
  0x58   :  { %v78_v22 = vadd.f32 %v77_v21, %v60_v5 }
  0x5a   :  { %v79_v23 = vsub.f32 %v78_v22, %v75_v20 }
  0x5c   :  { %v83_v24 = vmul.f32 %v144_v7, %v79_v23 }
  0x5e   :  { %93 = vst [vmem:[#allocation7] sm:$0xff] %v83_v24 }
  0x5f   :  { %260 = shalt.err (!%p257_p8)
}
  0x60   :  { %s261_s13 = scalar_lea.hbm %s382_s2, 128 }
  0x61   :  { %p262_p9 = scmp.ne.s32.totalorder %s382_s2, %s261_s13  ;;  %p265_p10 = scmp.lt.u32.totalorder %s261_s13, %s382_s2 }
  0x63   :  { %p267_p11 = pnand %p265_p10, %p262_p9 }
  0x65   :  { %270 = shalt.err (!%p267_p11)
}
  0x66   :  { %109 = dma.vmem_to_hbm [thread:$0]  %s107_s11, 128, %s382_s2, [#allocation4]  }
  0x67   :  { %275 = dma.done.wait [#allocation4], 128  }
  0x68   :  { %276 = vsyncadd [#allocation4], 4294967168 }
  0x69   :  { %277 = dma.done.wait [#allocation9], 256  }
  0x6a   :  { %278 = vsyncadd [#allocation9], 4294967040 }
  0x6b   :  { %139 = vsyncpa [#allocation3], 1 }
  0x6c   :  { %140 = vsyncpa [#allocation6], 1 }
  0x6d   :  { %141 = vsyncpa [#allocation4], 1 }
  0x6e   :  { %142 = vsyncpa [#allocation9], 1 }

</bundles_post_ra>
